<compile_context>
chip_gen: v7x
topology: tpu7x:2x2x1
jax: 0.10.0
libtpu: 0.0.40
codegen_flags: <defaults>
</compile_context>

<pallas_src>
import functools

import numpy as np
import jax
import jax.numpy as jnp
from jax.experimental import pallas as pl
from jax.experimental.pallas import tpu as pltpu

IMAGE_SIZE = 16           # small, consistent with the module (MNIST uses 28)
N = IMAGE_SIZE ** 2       # number of graph nodes (pixels); 256 = 2*128 lanes
NUM_CLASSES = 10
OUT_PAD = 128             # pad class dim to one full lane register
TB_MAX = 1024             # batch-tile cap; sweep 512-2048 (up to 4096 on v7x)


def precompute_adjacency_images(image_size: int) -> np.ndarray:
    """Numpy re-implementation of GraphNet.precompute_adjacency_images."""
    col, row = np.meshgrid(np.arange(image_size), np.arange(image_size))
    coord = np.stack((col, row), axis=2).reshape(-1, 2) / image_size   # (N, 2)
    diff = coord[:, None, :] - coord[None, :, :]
    dist = np.sqrt((diff ** 2).sum(-1))                                # cdist
    sigma = 0.05 * np.pi
    A = np.exp(-dist / sigma ** 2)
    A[A < 0.01] = 0.0
    A = A.astype(np.float32)
    D = A.sum(1)
    D_hat = (D + 1e-05) ** (-0.5)
    A_hat = D_hat.reshape(-1, 1) * A * D_hat.reshape(1, -1)
    A_hat[A_hat > 0.0001] = A_hat[A_hat > 0.0001] - 0.2
    return A_hat.astype(np.float32)


def build_fused_weight(a_hat: np.ndarray, fc_weight: np.ndarray) -> jnp.ndarray:
    """Model-load-time constant: W_fused = A.T @ W.T, padded to 128 lanes, bf16.

    out = (x @ A.T) @ W.T == x @ (A.T @ W.T) -- exact algebraic fusion
    (reassociation only; both operands are parameters, not data).
    The 118 padded lanes are exact zeros, so padded output lanes are zeros too.
    """
    a_t = np.asarray(a_hat, np.float32).T                      # (N, N)
    w_t = np.zeros((N, OUT_PAD), np.float32)
    w_t[:, :NUM_CLASSES] = np.asarray(fc_weight, np.float32).T
    w_fused = a_t @ w_t                                        # (N, OUT_PAD), f32
    return jnp.asarray(w_fused, dtype=jnp.bfloat16)


def graphnet_kernel(x_ref, w_ref, o_ref):
    # f32 X read -> in-kernel bf16 cast (VPU, hidden under DMA/MXU) ->
    # single MXU matmul (f32 accumulation) -> bf16 lane-dense writeback.
    o_ref[...] = jnp.dot(
        x_ref[...].astype(jnp.bfloat16), w_ref[...],
        preferred_element_type=jnp.float32,
    ).astype(o_ref.dtype)


def _round_up(x: int, m: int) -> int:
    return ((x + m - 1) // m) * m


@functools.partial(jax.jit, static_argnames=("tb_max",))
def graphnet_forward(x_nchw, w_fused_bf16, *, tb_max: int = TB_MAX):
    """x_nchw: (B, 1, H, W) f32; w_fused_bf16: (N, OUT_PAD) bf16 constant."""
    B = x_nchw.shape[0]
    x_flat = x_nchw.reshape(B, N)          # f32; metadata-only under jit

    # Batch tile: big enough to amortize per-grid-step overhead, but no bigger
    # than the (sublane-rounded) batch.  Multiple of 16 keeps bf16 output
    # blocks on native (16, 128) tiles.
    tb = min(_round_up(max(B, 1), 16), _round_up(tb_max, 16))
    n_tiles = pl.cdiv(B, tb)

    cost = pl.CostEstimate(
        flops=2 * B * N * OUT_PAD,
        transcendentals=0,
        bytes_accessed=B * N * 4            # f32 X read (single pass)
        + N * OUT_PAD * 2                    # bf16 resident weight
        + B * OUT_PAD * 2)                   # bf16 output writeback

    out_padded = pl.pallas_call(
        graphnet_kernel,
        out_shape=jax.ShapeDtypeStruct((B, OUT_PAD), jnp.bfloat16),
        grid_spec=pl.GridSpec(
            grid=(n_tiles,),
            in_specs=[
                pl.BlockSpec((tb, N), lambda b: (b, 0)),        # X: batch-tiled, f32
                pl.BlockSpec((N, OUT_PAD), lambda b: (0, 0)),   # W: VMEM-resident
            ],
            out_specs=pl.BlockSpec((tb, OUT_PAD), lambda b: (b, 0)),
        ),
        compiler_params=pltpu.CompilerParams(
            dimension_semantics=("parallel",)),                 # megacore on v7x
        cost_estimate=cost,
    )(x_flat, w_fused_bf16)

    # Padded lanes are exact zeros (zero-padded W_fused); this slice must stay.
    return out_padded[:, :NUM_CLASSES].astype(jnp.float32)      # (B, 10) f32


if __name__ == "__main__":
    B = 2
    key = jax.random.PRNGKey(0)
    k_x, k_w = jax.random.split(key)

    # Deterministic synthetic input batch (B, 1, H, W) -- NCHW like PyTorch.
    x = jax.random.normal(k_x, (B, 1, IMAGE_SIZE, IMAGE_SIZE), dtype=jnp.float32)

    # Deterministic fc weight (shape of nn.Linear(N, 10, bias=False).weight).
    bound = 1.0 / np.sqrt(N)
    fc_weight = jax.random.uniform(
        k_w, (NUM_CLASSES, N), minval=-bound, maxval=bound, dtype=jnp.float32)

    a_hat = precompute_adjacency_images(IMAGE_SIZE)

    # Hoisted, one-time constant construction (model-load time).
    w_fused_bf16 = build_fused_weight(a_hat, np.asarray(fc_weight))

    out = graphnet_forward(x, w_fused_bf16)
    out = jax.block_until_ready(out)
    assert out.shape == (B, NUM_CLASSES)

    # --- Reference checks (numpy, host-side) ---
    x_flat_f32 = np.asarray(x.reshape(B, -1), np.float32)

    # (1) Same bf16-rounded operands, f32 math: isolates MXU accumulation order
    #     + bf16 output rounding.
    x_bf = np.asarray(jnp.asarray(x_flat_f32).astype(jnp.bfloat16), np.float32)
    w_bf = np.asarray(w_fused_bf16.astype(jnp.float32), np.float32)
    ref_path = x_bf @ w_bf
    np.testing.assert_allclose(np.asarray(out), ref_path[:, :NUM_CLASSES],
                               rtol=2e-2, atol=2e-2)

    # (2) Original PyTorch-semantics reference in full f32 (unfused, exact A, W).
    #     Looser tolerance = accepted bf16 precision change for classification.
    ref_orig = (x_flat_f32 @ a_hat.T) @ np.asarray(fc_weight, np.float32).T
    np.testing.assert_allclose(np.asarray(out), ref_orig, rtol=6e-2, atol=6e-2)

    print("KERNEL_OK")
</pallas_src>

<mosaic_0001>
module attributes {stable_mosaic.version = 11 : i64} {
  func.func @graphnet_kernel(%arg0: i32, %arg1: memref<16x256xf32, #tpu.memory_space<vmem>>, %arg2: memref<256x128xbf16, #tpu.memory_space<vmem>>, %arg3: memref<16x128xbf16, #tpu.memory_space<vmem>>) attributes {dimension_semantics = [#tpu.dimension_semantics<parallel>], iteration_bounds = array<i64: 1>, scalar_prefetch = 0 : i64, scratch_operands = 0 : i64, tpu.core_type = #tpu.core_type<tc>, window_params = [{transform_indices = @transform_0, window_bounds = array<i64: 16, 256>}, {pipeline_mode = #tpu.pipeline_mode<synchronous>, transform_indices = @transform_1, window_bounds = array<i64: 256, 128>}, {transform_indices = @transform_2, window_bounds = array<i64: 16, 128>}]} {
    %c0 = arith.constant 0 : index
    %c0_0 = arith.constant 0 : index
    %0 = vector.load %arg1[%c0, %c0_0] : memref<16x256xf32, #tpu.memory_space<vmem>>, vector<16x256xf32>
    %1 = arith.truncf %0 : vector<16x256xf32> to vector<16x256xbf16>
    %c0_1 = arith.constant 0 : index
    %c0_2 = arith.constant 0 : index
    %2 = vector.load %arg2[%c0_1, %c0_2] : memref<256x128xbf16, #tpu.memory_space<vmem>>, vector<256x128xbf16>
    %cst = arith.constant dense<0.000000e+00> : vector<16x128xf32>
    %3 = tpu.matmul %1, %2, %cst {dimension_numbers = #tpu.dot_dimension_numbers<[1], [0], [0], [1], [0, 0, 1, 1], [], []>} : vector<16x256xbf16>, vector<256x128xbf16>, vector<16x128xf32> -> vector<16x128xf32>
    %4 = arith.truncf %3 : vector<16x128xf32> to vector<16x128xbf16>
    %c0_3 = arith.constant 0 : index
    %c0_4 = arith.constant 0 : index
    %5 = vector.load %arg3[%c0_3, %c0_4] : memref<16x128xbf16, #tpu.memory_space<vmem>>, vector<16x128xbf16>
    tpu.vector_store %arg3[%c0_3, %c0_4], %4 {strides = array<i32>} : memref<16x128xbf16, #tpu.memory_space<vmem>>, vector<16x128xbf16>,
    return
  }
  func.func @transform_0(%arg0: i32) -> (i32, i32) {
    %c0_i32 = arith.constant 0 : i32
    %c0_i32_0 = arith.constant 0 : i32
    return %arg0, %c0_i32 : i32, i32
  }
  func.func @transform_1(%arg0: i32) -> (i32, i32) {
    %c0_i32 = arith.constant 0 : i32
    %c0_i32_0 = arith.constant 0 : i32
    %c0_i32_1 = arith.constant 0 : i32
    return %c0_i32, %c0_i32_0 : i32, i32
  }
  func.func @transform_2(%arg0: i32) -> (i32, i32) {
    %c0_i32 = arith.constant 0 : i32
    %c0_i32_0 = arith.constant 0 : i32
    return %arg0, %c0_i32 : i32, i32
  }
}

</mosaic_0001>

<bundles_post_ra>
// kernel: graphnet_forward.1
= control target key start
LH: loop header
LB: loop body
LE: loop exit
PB: predicated region body
PF: predicated region fallthrough
CT: control target
= control target key end

     0   :  { %7 = vsyncpa [#allocation3], 0  ;;  %s456_s9 = smov [#allocation2]   ;;  %s502_s0 = inlined_call_operand.vmem [shape: f32[2,256], index: 0, kind: input, shape index: {}]   ;;  %s503_s1 = inlined_call_operand.hbm [shape: bf16[256,128], index: 1, kind: input, shape index: {}]   ;;  %s504_s2 = inlined_call_operand.vmem [shape: bf16[2,128], index: 2, kind: output, shape index: {}]  }
   0x1   :  { %s15_s10 = sshll.u32 %s456_s9, 4  ;;  %s432_s13 = scalar_lea.hbm %s503_s1, 2048  ;;  %s16_s10 = int_to_ptr.vmem [resolvable:$true] %s15_s10 }
   0x2   :  { %p433_p0 = scmp.ne.s32.totalorder %s503_s1, %s432_s13  ;;  %p436_p1 = scmp.lt.u32.totalorder %s432_s13, %s503_s1 }
   0x4   :  { %p438_p2 = pnand %p436_p1, %p433_p0 }
   0x6   :  { %441 = shalt.err (!%p438_p2)
}
   0x7   :  { %s442_s18 = scalar_lea.vmem %s16_s10, 2048  ;;  %p447_p4 = scmp.lt.s32.totalorder %s16_s10, %s16_s10 }
   0x8   :  { %p443_p3 = scmp.ne.s32.totalorder %s16_s10, %s442_s18  ;;  %p448_p5 = scmp.lt.s32.totalorder %s442_s18, %s442_s18 }
   0xa   :  { %p449_p6 = por %p448_p5, %p447_p4 }
   0xc   :  { %p450_p7 = pnand %p449_p6, %p443_p3 }
   0xe   :  { %453 = shalt.err (!%p450_p7)
}
   0xf   :  { %s457_s19 = smov 64   ;;  %s458_s20 = smov 4  }
  0x10   :  { %21 = dma.hbm_to_vmem [thread:$0]  %s503_s1, 2048, %s16_s10, [#allocation3], %s457_s19, %s457_s19, %s458_s20  }
  0x11   :  { %454 = dma.done.wait [#allocation3], 2048  }
  0x12   :  { %455 = vsyncadd [#allocation3], 4294965248  ;;  %v408_v0 = vld [vmem:[#allocation2 + $0x40] sm:$0xff]   ;;  %v410_v2 = vld [vmem:[#allocation2 + $0x48] sm:$0xff]   ;;  %v47_v7 = vlaneseq  ;;  %v459_v28 = vmov 1966171168  }
  0x13   :  { %v409_v1 = vld [vmem:[#allocation2] sm:$0xff]   ;;  %381 = vmatprep.subr.bf16.mxu0 %v408_v0  ;;  %v411_v3 = vld [vmem:[#allocation2 + $0x8] sm:$0xff]   ;;  %v412_v4 = vld [vmem:[#allocation2 + $0x50] sm:$0xff]   ;;  %v257_v29 = vunpack.c.l.s4 %v459_v28 }
  0x14   :  { %382 = vmatpush3.bf16.msra.mxu0 %v409_v1  ;;  %v413_v5 = vld [vmem:[#allocation2 + $0x10] sm:$0xff]   ;;  %v414_v6 = vld [vmem:[#allocation2 + $0x58] sm:$0xff]   ;;  %v416_v9 = vld [vmem:[#allocation2 + $0x60] sm:$0xff]   ;;  %v48_v10 = vshrl.u32 %v47_v7, 7 }
  0x15   :  { %383 = vmatprep.subr.bf16.mxu0 %v410_v2  ;;  %v415_v8 = vld [vmem:[#allocation2 + $0x18] sm:$0xff]   ;;  %v417_v11 = vld [vmem:[#allocation2 + $0x20] sm:$0xff]   ;;  %v418_v12 = vld [vmem:[#allocation2 + $0x68] sm:$0xff]   ;;  %v258_v30 = vunpack.c.0.s8 %v257_v29 }
  0x16   :  { %v419_v13 = vld [vmem:[#allocation2 + $0x28] sm:$0xff]   ;;  %v428_v14 = vld.sshfl [vmem:[%s502_s0] sm:$0xff pattern:$0x76325410]  ;;  %v420_v18 = vld [vmem:[#allocation2 + $0x70] sm:$0xff]  }
  0x17   :  { %v429_v15 = vld.sshfl [vmem:[%s502_s0 + $0x8] sm:$0xff pattern:$0x76325410]  ;;  %v430_v16 = vld.sshfl [vmem:[%s502_s0 + $0x10] sm:$0xff pattern:$0x76325410]  ;;  %v261_v36 = vsub.s32 %v258_v30, %v48_v10 }
  0x18   :  { %384 = vmatpush3.bf16.msra.mxu0 %v411_v3  ;;  %v431_v17 = vld.sshfl [vmem:[%s502_s0 + $0x18] sm:$0xff pattern:$0x76325410]  ;;  %v421_v19 = vld [vmem:[#allocation2 + $0x30] sm:$0xff]   ;;  %v59_v20 = vcombine.high %v428_v14, %v429_v15  ;;  %v58_v24 = vcombine.low %v428_v14, %v429_v15 }
  0x19   :  { %385 = vmatprep.subr.bf16.mxu0 %v412_v4  ;;  %v77_v21 = vcombine.high %v430_v16, %v431_v17  ;;  %v422_v22 = vld [vmem:[#allocation2 + $0x78] sm:$0xff]   ;;  %v76_v25 = vcombine.low %v430_v16, %v431_v17 }
  0x1a   :  { %v423_v26 = vld [vmem:[#allocation2 + $0x38] sm:$0xff]  }
  0x1b   :  { %v83_v23 = vpack.c.bf16 %v77_v21, %v59_v20  ;;  %v82_v27 = vpack.c.bf16 %v76_v25, %v58_v24 }
  0x1c   :  { %386 = vmatpush3.bf16.msra.mxu0 %v413_v5 }
  0x1d   :  { %387 = vmatprep.subr.bf16.mxu0 %v414_v6  ;;  %244 = vmatprep.mubr.bf16.mxu0 %v83_v23 }
  0x20   :  { %388 = vmatpush3.bf16.msra.mxu0 %v415_v8 }
  0x21   :  { %389 = vmatprep.subr.bf16.mxu0 %v416_v9 }
  0x24   :  { %390 = vmatpush3.bf16.msra.mxu0 %v417_v11 }
  0x25   :  { %391 = vmatprep.subr.bf16.mxu0 %v418_v12 }
  0x28   :  { %392 = vmatpush3.bf16.msra.mxu0 %v419_v13 }
  0x29   :  { %393 = vmatprep.subr.bf16.mxu0 %v420_v18 }
  0x2c   :  { %394 = vmatpush3.bf16.msra.mxu0 %v421_v19 }
  0x2d   :  { %395 = vmatprep.subr.bf16.mxu0 %v422_v22 }
  0x30   :  { %396 = vmatpush3.bf16.msra.mxu0 %v423_v26 }
  0x33   :  { %245 = vmatmul.mubr.bf16.vlgmr.msra.gmra.mrb[0].mxu0 %v82_v27 }
 0x106   :  { %v397_v31 = vpop.f32.mrb[0].mxu0 }
 0x107   :  { %v398_v32 = vpop.f32.mrb[1].mxu0 }
 0x108   :  { %v399_v33 = vadd.f32 %v398_v32, %v397_v31  ;;  %v400_v34 = vpop.f32.mrb[2].mxu0 }
 0x109   :  { %v401_v35 = vpop.f32.mrb[3].mxu0 }
 0x10a   :  { %v402_v37 = vadd.f32 %v401_v35, %v400_v34 }
 0x10c   :  { %v253_v38 = vpack.c.bf16 %v402_v37, %v399_v33 }
 0x10e   :  { %v262_v39 = vrot.slane %v253_v38, %v261_v36 }
 0x110   :  { %377 = vst.sshfl [vmem:[#allocation4] sm:$0x1 pattern:$0x73625140] %v262_v39 }
 0x117   :  { %v337_v40 = vld [vmem:[#allocation4] sm:$0x1] }
 0x118   :  { %338 = vst [vmem:[%s504_s2] sm:$0x1] %v337_v40 }
 0x119   :  { %355 = vsyncpa [#allocation3], 1 }

</bundles_post_ra>
